<compile_context>
chip_gen: v6e
topology: v6e:2x2x1
jax: 0.10.0
libtpu: 0.0.40
codegen_flags: <defaults>
</compile_context>

<pallas_src>
import jax
import jax.numpy as jnp
from jax import lax
from jax.experimental import pallas as pl
from jax.experimental.pallas import tpu as pltpu


def _conv_stats_kernel(p_ref, w_ref, b_ref, y_ref, stats_ref):
    # p_ref    : (9*Cin, THW)   pre-packed im2col patch tile (spatial on lanes)
    # w_ref    : (Cout, 9*Cin)  conv weight, tap-major (kh,kw), channel-minor
    # b_ref    : (Cout, 1)      conv bias
    # y_ref    : (Cout, THW)    conv+bias output tile (lane-dense)
    # stats_ref: (Cout, 2)      per-image [sum, sum-of-squares] accumulator
    y = jnp.dot(w_ref[...], p_ref[...], preferred_element_type=jnp.float32)
    y = y + b_ref[...]
    y_ref[...] = y

    # Streaming BatchNorm partials: accumulate across the row-tile axis in the
    # resident output block; it is written back to HBM once per image.
    @pl.when(pl.program_id(1) == 0)
    def _():
        stats_ref[...] = jnp.zeros_like(stats_ref)

    s = jnp.sum(y, axis=1, keepdims=True)
    ss = jnp.sum(y * y, axis=1, keepdims=True)
    stats_ref[...] += jnp.concatenate([s, ss], axis=1)


def _bn_relu_kernel(y_ref, scale_ref, shift_ref, o_ref):
    # y_ref: (Cout, THW); scale/shift: (Cout, 1) broadcast over lanes.
    o_ref[...] = jnp.maximum(y_ref[...] * scale_ref[...] + shift_ref[...], 0.0)


def _pick_tile_rows(H, W, max_tile_bytes=512 * 1024):
    """Largest divisor TH of H with TH*W a multiple of 256 (preferred) or 128
    and a bounded lane-tile footprint; falls back to TH = H."""
    best128 = None
    for th in range(H, 0, -1):
        if H % th:
            continue
        thw = th * W
        if thw * 4 > max_tile_bytes:
            continue
        if thw % 256 == 0:
            return th
        if best128 is None and thw % 128 == 0:
            best128 = th
    return best128 if best128 is not None else H


def conv_forward(x_nchw, weight_oihw, bias, gamma, beta, *, eps=1e-5):
    """x_nchw: (N, Cin, H, W) float32 -> (N, Cout, H, W) float32."""
    N, Cin, H, W = x_nchw.shape
    Cout = weight_oihw.shape[0]

    TH = _pick_tile_rows(H, W)
    HT = H // TH
    THW = TH * W
    HW = H * W

    # ---- wrapper glue (XLA, small): im2col pre-pack --------------------------
    # Keeps the kernel free of lane-starved relayout work at small Cin.
    # TODO(synk): for large Cin, switch to an overlapping-window input BlockSpec
    # with in-kernel taps to avoid the 9x im2col duplication in HBM.
    xp = jnp.pad(x_nchw, ((0, 0), (0, 0), (1, 1), (1, 1)))
    taps = [xp[:, :, kh:kh + H, kw:kw + W] for kh in range(3) for kw in range(3)]
    patch = jnp.stack(taps, axis=1).reshape(N, 9 * Cin, HT, THW)
    patch = jnp.transpose(patch, (0, 2, 1, 3))          # (N, HT, 9*Cin, THW)

    # (Cout, Cin, 3, 3) -> (Cout, 9*Cin), tap-major (kh, kw), channel-minor.
    w2 = jnp.transpose(weight_oihw, (0, 2, 3, 1)).reshape(Cout, 9 * Cin)
    b2 = bias.reshape(Cout, 1)

    vmem_limit = 32 * 1024 * 1024  # within scoped-VMEM budgets on v5e/v6e/v7x

    # ---- pass 1: conv + bias + per-image BN partials --------------------------
    y, stats = pl.pallas_call(
        _conv_stats_kernel,
        grid=(N, HT),
        in_specs=[
            pl.BlockSpec((None, None, 9 * Cin, THW), lambda n, t: (n, t, 0, 0)),
            pl.BlockSpec((Cout, 9 * Cin), lambda n, t: (0, 0)),
            pl.BlockSpec((Cout, 1), lambda n, t: (0, 0)),
        ],
        out_specs=(
            pl.BlockSpec((None, Cout, THW), lambda n, t: (n, 0, t)),
            pl.BlockSpec((None, Cout, 2), lambda n, t: (n, 0, 0)),
        ),
        out_shape=(
            # TODO(synk): a bf16 intermediate y would halve pass-2 HBM traffic
            # but does not meet the 1e-4 validation tolerance; kept f32.
            jax.ShapeDtypeStruct((N, Cout, HW), jnp.float32),
            jax.ShapeDtypeStruct((N, Cout, 2), jnp.float32),
        ),
        compiler_params=pltpu.CompilerParams(
            dimension_semantics=("parallel", "arbitrary"),
            vmem_limit_bytes=vmem_limit),
    )(patch, w2, b2)

    # ---- global BN statistics (tiny reduction over N in XLA) -----------------
    count = jnp.float32(N * H * W)
    tot = jnp.sum(stats, axis=0)                        # (Cout, 2)
    mean = tot[:, 0] / count
    var = jnp.maximum(tot[:, 1] / count - mean * mean, 0.0)   # biased variance
    # TODO(synk): E[y^2]-E[y]^2 is cancellation-prone at very large N*H*W;
    # switch to a centered/Welford-style accumulation if real shapes are large.
    inv = lax.rsqrt(var + eps)
    scale = (gamma * inv).reshape(Cout, 1)
    shift = (beta - mean * gamma * inv).reshape(Cout, 1)

    # ---- pass 2: normalize + affine + ReLU, written straight in (N,C,H*W) ----
    out = pl.pallas_call(
        _bn_relu_kernel,
        grid=(N, HT),
        in_specs=[
            pl.BlockSpec((None, Cout, THW), lambda n, t: (n, 0, t)),
            pl.BlockSpec((Cout, 1), lambda n, t: (0, 0)),
            pl.BlockSpec((Cout, 1), lambda n, t: (0, 0)),
        ],
        out_specs=pl.BlockSpec((None, Cout, THW), lambda n, t: (n, 0, t)),
        out_shape=jax.ShapeDtypeStruct((N, Cout, HW), jnp.float32),
        compiler_params=pltpu.CompilerParams(
            dimension_semantics=("parallel", "parallel"),
            vmem_limit_bytes=vmem_limit),
    )(y, scale, shift)

    # (N, Cout, H*W) -> (N, Cout, H, W): contiguous reshape, no transpose.
    return out.reshape(N, Cout, H, W)


def _reference(x, weight, bias, gamma, beta):
    y = lax.conv_general_dilated(
        x, weight, window_strides=(1, 1), padding="SAME",
        dimension_numbers=("NCHW", "OIHW", "NCHW"))
    y = y + bias[None, :, None, None]
    mean = y.mean(axis=(0, 2, 3), keepdims=True)
    var = jnp.square(y - mean).mean(axis=(0, 2, 3), keepdims=True)
    y = (y - mean) * lax.rsqrt(var + 1e-5)
    y = y * gamma[None, :, None, None] + beta[None, :, None, None]
    return jnp.maximum(y, 0.0)


if __name__ == "__main__":
    N, Cin, Cout, H, W = 2, 4, 8, 16, 16

    key = jax.random.PRNGKey(0)
    kx, kw, kb = jax.random.split(key, 3)

    x = jax.random.normal(kx, (N, Cin, H, W), dtype=jnp.float32)
    weight = 0.1 * jax.random.normal(kw, (Cout, Cin, 3, 3), dtype=jnp.float32)
    bias = 0.1 * jax.random.normal(kb, (Cout,), dtype=jnp.float32)
    gamma = jnp.ones((Cout,), dtype=jnp.float32)   # BN weight default init
    beta = jnp.zeros((Cout,), dtype=jnp.float32)   # BN bias default init

    fwd = jax.jit(conv_forward)
    out = jax.block_until_ready(fwd(x, weight, bias, gamma, beta))

    ref = jax.block_until_ready(_reference(x, weight, bias, gamma, beta))
    assert out.shape == (N, Cout, H, W)
    assert jnp.allclose(out, ref, atol=1e-4, rtol=1e-4), "mismatch vs reference"

    print("KERNEL_OK")
</pallas_src>

<mosaic_0001>
module attributes {stable_mosaic.version = 11 : i64} {
  func.func @_conv_stats_kernel(%arg0: i32, %arg1: i32, %arg2: memref<1x1x36x256xf32, #tpu.memory_space<vmem>>, %arg3: memref<8x36xf32, #tpu.memory_space<vmem>>, %arg4: memref<8x1xf32, #tpu.memory_space<vmem>>, %arg5: memref<1x8x256xf32, #tpu.memory_space<vmem>>, %arg6: memref<1x8x2xf32, #tpu.memory_space<vmem>>) attributes {dimension_semantics = [#tpu.dimension_semantics<parallel>, #tpu.dimension_semantics<arbitrary>], iteration_bounds = array<i64: 2, 1>, scalar_prefetch = 0 : i64, scratch_operands = 0 : i64, tpu.core_type = #tpu.core_type<tc>, window_params = [{transform_indices = @transform_0, window_bounds = array<i64: 1, 1, 36, 256>}, {pipeline_mode = #tpu.pipeline_mode<synchronous>, transform_indices = @transform_1, window_bounds = array<i64: 8, 36>}, {pipeline_mode = #tpu.pipeline_mode<synchronous>, transform_indices = @transform_2, window_bounds = array<i64: 8, 1>}, {transform_indices = @transform_3, window_bounds = array<i64: 1, 8, 256>}, {transform_indices = @transform_4, window_bounds = array<i64: 1, 8, 2>}]} {
    %c0 = arith.constant 0 : index
    %c0_0 = arith.constant 0 : index
    %0 = vector.load %arg3[%c0, %c0_0] : memref<8x36xf32, #tpu.memory_space<vmem>>, vector<8x36xf32>
    %c0_1 = arith.constant 0 : index
    %c0_2 = arith.constant 0 : index
    %c0_3 = arith.constant 0 : index
    %c0_4 = arith.constant 0 : index
    %1 = vector.load %arg2[%c0_1, %c0_2, %c0_3, %c0_4] : memref<1x1x36x256xf32, #tpu.memory_space<vmem>>, vector<1x1x36x256xf32>
    %2 = vector.shape_cast %1 : vector<1x1x36x256xf32> to vector<36x256xf32>
    %cst = arith.constant dense<0.000000e+00> : vector<8x256xf32>
    %3 = tpu.matmul %0, %2, %cst {dimension_numbers = #tpu.dot_dimension_numbers<[1], [0], [0], [1], [0, 0, 1, 1], [], []>} : vector<8x36xf32>, vector<36x256xf32>, vector<8x256xf32> -> vector<8x256xf32>
    %c0_5 = arith.constant 0 : index
    %c0_6 = arith.constant 0 : index
    %4 = vector.load %arg4[%c0_5, %c0_6] : memref<8x1xf32, #tpu.memory_space<vmem>>, vector<8x1xf32>
    %5 = vector.broadcast %4 : vector<8x1xf32> to vector<8x256xf32>
    %6 = arith.addf %3, %5 : vector<8x256xf32>
    %c0_7 = arith.constant 0 : index
    %c0_8 = arith.constant 0 : index
    %c0_9 = arith.constant 0 : index
    %7 = vector.load %arg5[%c0_7, %c0_8, %c0_9] : memref<1x8x256xf32, #tpu.memory_space<vmem>>, vector<1x8x256xf32>
    %8 = vector.shape_cast %7 : vector<1x8x256xf32> to vector<8x256xf32>
    %9 = vector.shape_cast %6 : vector<8x256xf32> to vector<1x8x256xf32>
    tpu.vector_store %arg5[%c0_7, %c0_8, %c0_9], %9 {strides = array<i32>} : memref<1x8x256xf32, #tpu.memory_space<vmem>>, vector<1x8x256xf32>,
    %c0_i32 = arith.constant 0 : i32
    %10 = arith.cmpi eq, %arg1, %c0_i32 : i32
    %11 = arith.extui %10 : i1 to i32
    %c0_i32_10 = arith.constant 0 : i32
    %12 = arith.cmpi ne, %11, %c0_i32_10 : i32
    scf.if %12 {
      %cst_19 = arith.constant 0.000000e+00 : f32
      %25 = vector.broadcast %cst_19 : f32 to vector<8x2xf32>
      %c0_20 = arith.constant 0 : index
      %c0_21 = arith.constant 0 : index
      %c0_22 = arith.constant 0 : index
      %26 = vector.load %arg6[%c0_20, %c0_21, %c0_22] : memref<1x8x2xf32, #tpu.memory_space<vmem>>, vector<1x8x2xf32>
      %27 = vector.shape_cast %26 : vector<1x8x2xf32> to vector<8x2xf32>
      %28 = vector.shape_cast %25 : vector<8x2xf32> to vector<1x8x2xf32>
      tpu.vector_store %arg6[%c0_20, %c0_21, %c0_22], %28 {strides = array<i32>} : memref<1x8x2xf32, #tpu.memory_space<vmem>>, vector<1x8x2xf32>,
    } else {
    }
    %cst_11 = arith.constant dense<0.000000e+00> : vector<8xf32>
    %13 = vector.multi_reduction <add>, %6, %cst_11 [1] : vector<8x256xf32> to vector<8xf32>
    %14 = vector.shape_cast %13 : vector<8xf32> to vector<8x1xf32>
    %15 = arith.mulf %6, %6 : vector<8x256xf32>
    %cst_12 = arith.constant dense<0.000000e+00> : vector<8xf32>
    %16 = vector.multi_reduction <add>, %15, %cst_12 [1] : vector<8x256xf32> to vector<8xf32>
    %17 = vector.shape_cast %16 : vector<8xf32> to vector<8x1xf32>
    %c0_13 = arith.constant 0 : index
    %c0_14 = arith.constant 0 : index
    %c0_15 = arith.constant 0 : index
    %18 = vector.load %arg6[%c0_13, %c0_14, %c0_15] : memref<1x8x2xf32, #tpu.memory_space<vmem>>, vector<1x8x2xf32>
    %19 = vector.shape_cast %18 : vector<1x8x2xf32> to vector<8x2xf32>
    %20 = tpu.concatenate %14, %17 in 1 : vector<8x1xf32>, vector<8x1xf32> -> vector<8x2xf32>
    %21 = arith.addf %19, %20 : vector<8x2xf32>
    %c0_16 = arith.constant 0 : index
    %c0_17 = arith.constant 0 : index
    %c0_18 = arith.constant 0 : index
    %22 = vector.load %arg6[%c0_16, %c0_17, %c0_18] : memref<1x8x2xf32, #tpu.memory_space<vmem>>, vector<1x8x2xf32>
    %23 = vector.shape_cast %22 : vector<1x8x2xf32> to vector<8x2xf32>
    %24 = vector.shape_cast %21 : vector<8x2xf32> to vector<1x8x2xf32>
    tpu.vector_store %arg6[%c0_16, %c0_17, %c0_18], %24 {strides = array<i32>} : memref<1x8x2xf32, #tpu.memory_space<vmem>>, vector<1x8x2xf32>,
    return
  }
  func.func @transform_0(%arg0: i32, %arg1: i32) -> (i32, i32, i32, i32) {
    %c0_i32 = arith.constant 0 : i32
    %c0_i32_0 = arith.constant 0 : i32
    %c0_i32_1 = arith.constant 0 : i32
    return %arg0, %arg1, %c0_i32, %c0_i32_0 : i32, i32, i32, i32
  }
  func.func @transform_1(%arg0: i32, %arg1: i32) -> (i32, i32) {
    %c0_i32 = arith.constant 0 : i32
    %c0_i32_0 = arith.constant 0 : i32
    %c0_i32_1 = arith.constant 0 : i32
    return %c0_i32, %c0_i32_0 : i32, i32
  }
  func.func @transform_2(%arg0: i32, %arg1: i32) -> (i32, i32) {
    %c0_i32 = arith.constant 0 : i32
    %c0_i32_0 = arith.constant 0 : i32
    %c0_i32_1 = arith.constant 0 : i32
    return %c0_i32, %c0_i32_0 : i32, i32
  }
  func.func @transform_3(%arg0: i32, %arg1: i32) -> (i32, i32, i32) {
    %c0_i32 = arith.constant 0 : i32
    %c0_i32_0 = arith.constant 0 : i32
    return %arg0, %c0_i32, %arg1 : i32, i32, i32
  }
  func.func @transform_4(%arg0: i32, %arg1: i32) -> (i32, i32, i32) {
    %c0_i32 = arith.constant 0 : i32
    %c0_i32_0 = arith.constant 0 : i32
    %c0_i32_1 = arith.constant 0 : i32
    return %arg0, %c0_i32, %c0_i32_0 : i32, i32, i32
  }
}

module attributes {stable_mosaic.version = 11 : i64} {
  func.func @_bn_relu_kernel(%arg0: i32, %arg1: i32, %arg2: memref<1x8x256xf32, #tpu.memory_space<vmem>>, %arg3: memref<8x1xf32, #tpu.memory_space<vmem>>, %arg4: memref<8x1xf32, #tpu.memory_space<vmem>>, %arg5: memref<1x8x256xf32, #tpu.memory_space<vmem>>) attributes {dimension_semantics = [#tpu.dimension_semantics<parallel>, #tpu.dimension_semantics<parallel>], iteration_bounds = array<i64: 2, 1>, scalar_prefetch = 0 : i64, scratch_operands = 0 : i64, tpu.core_type = #tpu.core_type<tc>, window_params = [{transform_indices = @transform_0, window_bounds = array<i64: 1, 8, 256>}, {pipeline_mode = #tpu.pipeline_mode<synchronous>, transform_indices = @transform_1, window_bounds = array<i64: 8, 1>}, {pipeline_mode = #tpu.pipeline_mode<synchronous>, transform_indices = @transform_2, window_bounds = array<i64: 8, 1>}, {transform_indices = @transform_3, window_bounds = array<i64: 1, 8, 256>}]} {
    %c0 = arith.constant 0 : index
    %c0_0 = arith.constant 0 : index
    %c0_1 = arith.constant 0 : index
    %0 = vector.load %arg2[%c0, %c0_0, %c0_1] : memref<1x8x256xf32, #tpu.memory_space<vmem>>, vector<1x8x256xf32>
    %1 = vector.shape_cast %0 : vector<1x8x256xf32> to vector<8x256xf32>
    %c0_2 = arith.constant 0 : index
    %c0_3 = arith.constant 0 : index
    %2 = vector.load %arg3[%c0_2, %c0_3] : memref<8x1xf32, #tpu.memory_space<vmem>>, vector<8x1xf32>
    %3 = vector.broadcast %2 : vector<8x1xf32> to vector<8x256xf32>
    %4 = arith.mulf %1, %3 : vector<8x256xf32>
    %c0_4 = arith.constant 0 : index
    %c0_5 = arith.constant 0 : index
    %5 = vector.load %arg4[%c0_4, %c0_5] : memref<8x1xf32, #tpu.memory_space<vmem>>, vector<8x1xf32>
    %6 = vector.broadcast %5 : vector<8x1xf32> to vector<8x256xf32>
    %7 = arith.addf %4, %6 : vector<8x256xf32>
    %cst = arith.constant 0.000000e+00 : f32
    %8 = vector.broadcast %cst : f32 to vector<8x256xf32>
    %9 = arith.maximumf %7, %8 : vector<8x256xf32>
    %c0_6 = arith.constant 0 : index
    %c0_7 = arith.constant 0 : index
    %c0_8 = arith.constant 0 : index
    %10 = vector.load %arg5[%c0_6, %c0_7, %c0_8] : memref<1x8x256xf32, #tpu.memory_space<vmem>>, vector<1x8x256xf32>
    %11 = vector.shape_cast %10 : vector<1x8x256xf32> to vector<8x256xf32>
    %12 = vector.shape_cast %9 : vector<8x256xf32> to vector<1x8x256xf32>
    tpu.vector_store %arg5[%c0_6, %c0_7, %c0_8], %12 {strides = array<i32>} : memref<1x8x256xf32, #tpu.memory_space<vmem>>, vector<1x8x256xf32>,
    return
  }
  func.func @transform_0(%arg0: i32, %arg1: i32) -> (i32, i32, i32) {
    %c0_i32 = arith.constant 0 : i32
    %c0_i32_0 = arith.constant 0 : i32
    return %arg0, %c0_i32, %arg1 : i32, i32, i32
  }
  func.func @transform_1(%arg0: i32, %arg1: i32) -> (i32, i32) {
    %c0_i32 = arith.constant 0 : i32
    %c0_i32_0 = arith.constant 0 : i32
    %c0_i32_1 = arith.constant 0 : i32
    return %c0_i32, %c0_i32_0 : i32, i32
  }
  func.func @transform_2(%arg0: i32, %arg1: i32) -> (i32, i32) {
    %c0_i32 = arith.constant 0 : i32
    %c0_i32_0 = arith.constant 0 : i32
    %c0_i32_1 = arith.constant 0 : i32
    return %c0_i32, %c0_i32_0 : i32, i32
  }
  func.func @transform_3(%arg0: i32, %arg1: i32) -> (i32, i32, i32) {
    %c0_i32 = arith.constant 0 : i32
    %c0_i32_0 = arith.constant 0 : i32
    return %arg0, %c0_i32, %arg1 : i32, i32, i32
  }
}

</mosaic_0001>

<bundles_post_ra>
// kernel: conv_forward.2
= control target key start
LH: loop header
LB: loop body
LE: loop exit
PB: predicated region body
PF: predicated region fallthrough
CT: control target
= control target key end

     0   :  { %s582_s15 = smov 0   ;;  %s584_s16 = smov 0   ;;  %s636_s0 = inlined_call_operand.vmem [shape: f32[2,1,36,256], index: 0, kind: input, shape index: {}]   ;;  %s637_s1 = inlined_call_operand.vmem [shape: f32[8,36], index: 1, kind: input, shape index: {}]   ;;  %s638_s2 = inlined_call_operand.vmem [shape: f32[8,1], index: 2, kind: input, shape index: {}]   ;;  %s639_s3 = inlined_call_operand.vmem [shape: f32[2,8,256], index: 3, kind: output, shape index: {0}]   ;;  %s640_s4 = inlined_call_operand.vmem [shape: f32[2,8,2], index: 4, kind: output, shape index: {1}]  }
   0x1   :  { %s586_s17 = smov 0  }
   0x2 LB: > { %s27_s18 = sadd.s32 1, %s549_s16  ;;  %p492_p0 = scmp.ge.s32.totalorder %s553_s17, 1  ;;  %s553_s17 = sphi %s586_s17, %s15_s17   ;;  %s549_s16 = sphi %s584_s16, %s642_s16   ;;  %s545_s15 = sphi %s582_s15, %s641_s15  }
   0x3   : > { %p29_p1 = scmp.ge.s32.totalorder %s27_s18, 2  ;;  %p185_p2 = scmp.lt.s32.totalorder %s553_s17, 3 }
   0x5   : > { %s644_s18 = smov (%p29_p1, %s27_s18), 0  ;;  %p186_p3 = pnand %p492_p0, %p185_p2 }
   0x6   : > { %p223_p4 = scmp.lt.s32.totalorder (!%p186_p3), %s545_s15, 1 }
   0x7   : > { %189 = sbr.rel (%p186_p3) target bundleno = 370 (0x172), region = 32 }
   0xc   : > { %v555_v0 = vmov 0.0   ;;  %v257_v1 = vld [vmem:[%s638_s2] sm:$0xff]  ;;  %s646_s15 = smov (!%p223_p4, %s545_s15), 1  ;;  %v556_v2 = vmov 0   ;;  %vm351_vm0 = vcmask 15360   ;;  %vm267_vm1 = vcmask 1043456  }
   0xd   : > { %338 = vmatprep.mubr.f32.mxu0 %v555_v0  ;;  %530 = vset.pattern.permute.xlu0 %v556_v2  ;;  %s503_s21 = smul.u32 80, %s646_s15  ;;  %s496_s22 = sshll.u32 %s646_s15, 3  ;;  %v246_v13 = vld [vmem:[%s637_s1] sm:$0xff]  ;;  %vm263_vm2 = vcmask 293888   ;;  %vm362_vm3 = vcmask 7168  }
   0xe   : > { %260 = vperm.xlu0 %530, %v257_v1   ;;  %s610_s25 = scalar_lea.vmem %s640_s4, %s496_s22  ;;  %s502_s5 = sshll.u32 %s646_s15, 4 }
   0xf   : > { %s231_s28 = scalar_lea.vmem %s636_s0, %s503_s21  ;;  %352 = vst.msk [vmem:[%s610_s25] sm:$0xff] %vm351_vm0, %v555_v0  ;;  %s240_s8 = scalar_lea.vmem %s639_s3, %s502_s5 }
  0x10   : > { %v256_v3 = vld [vmem:[%s231_s28 + $0x48] sm:$0xf]  ;;  %v255_v4 = vld [vmem:[%s231_s28 + $0x40] sm:$0xf]  ;;  %v254_v5 = vld [vmem:[%s231_s28 + $0x38] sm:$0xff] }
  0x11   : > { %497 = vmatprep.subr.msk.mxu0 %vm267_vm1, %v256_v3  ;;  %v253_v6 = vld [vmem:[%s231_s28 + $0x30] sm:$0xff]  ;;  %v252_v7 = vld [vmem:[%s231_s28 + $0x28] sm:$0xff]  ;;  %v251_v8 = vld [vmem:[%s231_s28 + $0x20] sm:$0xff] }
  0x12   : > { %498 = vmatpush1.msk.msra.mxu0 %vm267_vm1, %v255_v4  ;;  %v250_v9 = vld [vmem:[%s231_s28 + $0x18] sm:$0xff]  ;;  %v249_v10 = vld [vmem:[%s231_s28 + $0x10] sm:$0xff]  ;;  %v248_v11 = vld [vmem:[%s231_s28 + $0x8] sm:$0xff] }
  0x13   : > { %298 = vmatprep.subr.mxu0 %v254_v5  ;;  %v247_v12 = vld [vmem:[%s231_s28] sm:$0xff] }
  0x14   : > { %299 = vmatpush1.msra.mxu0 %v253_v6 }
  0x15   : > { %300 = vmatprep.subr.mxu0 %v252_v7 }
  0x16   : > { %301 = vmatpush1.msra.mxu0 %v251_v8  ;;  %v361_v23 = vld [vmem:[%s610_s25] sm:$0xff] }
  0x17   : > { %302 = vmatprep.subr.mxu0 %v250_v9 }
  0x18   : > { %303 = vmatpush1.msra.mxu0 %v249_v10 }
  0x19   : > { %304 = vmatprep.subr.mxu0 %v248_v11 }
  0x1a   : > { %305 = vmatpush1.msra.mxu0 %v247_v12 }
  0x1b   : > { %499 = vmatmul.mubr.msk.f32.vlgmr.msra.gmra.mxu0 %vm263_vm2, %v246_v13 }
  0x89   : > { %v261_v14 = vpop.permute.xlu0 %260 }
  0xdb   : > { %v340_v15 = vpop.f32.mrf.mxu0 }
  0xdc   : > { %v341_v16 = vadd.f32 %v340_v15, %v261_v14 }
  0xdd   : > { %v342_v17 = vpop.f32.mrf.mxu0 }
  0xde   : > { %345 = vst [vmem:[%s240_s8] sm:$0xff] %v341_v16  ;;  %v343_v18 = vadd.f32 %v342_v17, %v261_v14  ;;  %v356_v20 = vmul.f32 %v341_v16, %v341_v16 }
  0xe0   : > { %346 = vst [vmem:[%s240_s8 + $0x8] sm:$0xff] %v343_v18  ;;  %v353_v19 = vadd.f32 %v343_v18, %v341_v16  ;;  %v357_v21 = vmul.f32 %v343_v18, %v343_v18 }
  0xe2   : > { %354 = vadd.xlane.f32.xlu0 %v353_v19  ;;  %v358_v22 = vadd.f32 %v357_v21, %v356_v20 }
  0xe4   : > { %359 = vadd.xlane.f32.xlu1 %v358_v22 }
 0x16b   : > { %v355_v24 = vpop.xlane.xlu0 %354 }
 0x16d   : > { %v360_v25 = vpop.xlane.xlu1 %359 }
 0x16e   : > { %v363_v26 = vsel %vm362_vm3, %v355_v24, %v360_v25 }
 0x16f   : > { %v364_v27 = vadd.f32 %v363_v26, %v361_v23 }
 0x171   : > { %366 = vst.msk [vmem:[%s610_s25] sm:$0xff] %vm351_vm0, %v364_v27 }
 0x172 PF: > { %s15_s17 = sadd.s32 1, %s553_s17   ;;  %s641_s15 = smov %s549_s16 }
 0x173   : > { %p12_p5 = scmp.ge.s32.totalorder %s15_s17, 4   ;;  %s642_s16 = smov %s644_s18 }
 0x175   :  { %14 = sbr.rel (!%p12_p5) target bundleno = 2 (0x2), region = 78 }

// kernel: conv_forward.3
= control target key start
LH: loop header
LB: loop body
LE: loop exit
PB: predicated region body
PF: predicated region fallthrough
CT: control target
= control target key end

     0   :  { %s403_s12 = smov 0   ;;  %s405_s13 = smov 0   ;;  %s442_s0 = inlined_call_operand.vmem [shape: f32[2,8,256], index: 0, kind: input, shape index: {}]   ;;  %s443_s1 = inlined_call_operand.vmem [shape: f32[8,1], index: 1, kind: input, shape index: {}]   ;;  %s444_s2 = inlined_call_operand.vmem [shape: f32[8,1], index: 2, kind: input, shape index: {}]   ;;  %s445_s3 = inlined_call_operand.vmem [shape: f32[2,8,256], index: 3, kind: output, shape index: {}]  }
   0x1   :  { %s407_s14 = smov 0  }
   0x2 LB: > { %s25_s15 = sadd.s32 1, %s376_s13  ;;  %p323_p0 = scmp.ge.s32.totalorder %s380_s14, 1  ;;  %s380_s14 = sphi %s407_s14, %s13_s14   ;;  %s376_s13 = sphi %s405_s13, %s447_s13   ;;  %s372_s12 = sphi %s403_s12, %s446_s12  }
   0x3   : > { %p27_p1 = scmp.ge.s32.totalorder %s25_s15, 2  ;;  %p158_p2 = scmp.lt.s32.totalorder %s380_s14, 3 }
   0x5   : > { %s449_s15 = smov (%p27_p1, %s25_s15), 0  ;;  %p159_p3 = pnand %p323_p0, %p158_p2 }
   0x6   : > { %p191_p4 = scmp.lt.s32.totalorder (!%p159_p3), %s372_s12, 1 }
   0x7   : > { %162 = sbr.rel (%p159_p3) target bundleno = 147 (0x93), region = 32 }
   0xc   : > { %v212_v0 = vld [vmem:[%s443_s1] sm:$0xff]  ;;  %v382_v1 = vmov 0   ;;  %s451_s12 = smov (!%p191_p4, %s372_s12), 1 }
   0xd   : > { %357 = vset.pattern.permute.xlu0 %v382_v1  ;;  %v220_v2 = vld [vmem:[%s444_s2] sm:$0xff]  ;;  %s330_s20 = sshll.u32 %s451_s12, 4 }
   0xe   : > { %215 = vperm.xlu0 %357, %v212_v0   ;;  %s198_s23 = scalar_lea.vmem %s442_s0, %s330_s20  ;;  %s208_s26 = scalar_lea.vmem %s445_s3, %s330_s20 }
   0xf   : > { %v210_v4 = vld [vmem:[%s198_s23] sm:$0xff]  ;;  %v211_v5 = vld [vmem:[%s198_s23 + $0x8] sm:$0xff] }
  0x12   : > { %223 = vperm.xlu0 %357, %v220_v2  }
  0x89   : > { %v216_v3 = vpop.permute.xlu0 %215 }
  0x8a   : > { %v218_v6 = vmul.f32 %v216_v3, %v210_v4  ;;  %v219_v7 = vmul.f32 %v216_v3, %v211_v5 }
  0x8d   : > { %v224_v8 = vpop.permute.xlu0 %223 }
  0x8e   : > { %v226_v9 = vadd.f32 %v224_v8, %v218_v6  ;;  %v227_v10 = vadd.f32 %v224_v8, %v219_v7 }
  0x90   : > { %v228_v11 = vmax.f32 %v226_v9, 0.0  ;;  %v229_v12 = vmax.f32 %v227_v10, 0.0 }
  0x92   : > { %230 = vst [vmem:[%s208_s26] sm:$0xff] %v228_v11  ;;  %231 = vst [vmem:[%s208_s26 + $0x8] sm:$0xff] %v229_v12 }
  0x93 PF: > { %s13_s14 = sadd.s32 1, %s380_s14   ;;  %s446_s12 = smov %s376_s13 }
  0x94   : > { %p10_p5 = scmp.ge.s32.totalorder %s13_s14, 4   ;;  %s447_s13 = smov %s449_s15 }
  0x96   :  { %12 = sbr.rel (!%p10_p5) target bundleno = 2 (0x2), region = 62 }

</bundles_post_ra>
